<compile_context>
chip_gen: v7x
topology: tpu7x:2x2x1
jax: 0.10.0
libtpu: 0.0.40
codegen_flags: <defaults>
</compile_context>

<pallas_src>
import functools

import jax
import jax.numpy as jnp
from jax.experimental import pallas as pl
from jax.experimental.pallas import tpu as pltpu


def _round_up(x: int, m: int) -> int:
    return ((x + m - 1) // m) * m


# Weight (bf16, padded) below this size is kept fully VMEM-resident (small path).
_SMALL_WEIGHT_BYTES = 2 * 1024 * 1024
# Big-path tile caps: double-buffered bf16 inputs + f32 out + f32 acc ~ 10 MiB.
_BIG_TM = 512
_BIG_TK = 512
_BIG_TN = 1024

# Generation-aware scoped-VMEM limit (best effort; 48 MiB is safe on v5e/v6e/v7x
# and far above the ~10 MiB actually used by the big-path tiles).
try:  # pragma: no cover - depends on backend
    _VMEM_LIMIT = min(48 << 20, int(pltpu.get_tpu_info().vmem_capacity_bytes * 3 // 4))
except Exception:  # noqa: BLE001
    _VMEM_LIMIT = 48 << 20


# ----------------------------------------------------------------------------
# Kernels
# ----------------------------------------------------------------------------
def _fclayer_small_kernel(x_ref, w_ref, b_ref, o_ref):
    """Whole (padded) weight + bias resident; one MXU pass + fused epilogue."""
    y = jnp.dot(x_ref[...], w_ref[...], preferred_element_type=jnp.float32)
    y = y + b_ref[...]                       # (tm, N_pad) + (1, N_pad), f32
    o_ref[...] = jnp.maximum(y, 0.2 * y).astype(o_ref.dtype)   # LeakyReLU(0.2)


def _fclayer_gemm_kernel(x_ref, w_ref, b_ref, o_ref, acc_ref):
    """Generic tiled GEMM with resident f32 accumulator; epilogue-only bias/act."""
    k = pl.program_id(2)

    @pl.when(k == 0)
    def _init():
        acc_ref[...] = jnp.zeros_like(acc_ref)

    acc_ref[...] += jnp.dot(
        x_ref[...], w_ref[...], preferred_element_type=jnp.float32
    )

    @pl.when(k == pl.num_programs(2) - 1)
    def _epilogue():
        y = acc_ref[...] + b_ref[...]
        o_ref[...] = jnp.maximum(y, 0.2 * y).astype(o_ref.dtype)


# ----------------------------------------------------------------------------
# Parameter preparation (one-time; hoisted out of the forward path)
# ----------------------------------------------------------------------------
def prepare_fclayer_params(w_t, b, compute_dtype=jnp.bfloat16):
    """Pad + cast the static weight/bias once.

    w_t: (innodes, nodes) — PyTorch weight pre-transposed.
    b:   (nodes,) or (1, nodes).
    Returns (w_padded_bf16, b_padded_f32, static_meta_dict).
    """
    K, N = w_t.shape
    K128, N128 = _round_up(K, 128), _round_up(N, 128)
    itemsize = jnp.dtype(compute_dtype).itemsize
    small = (K128 * N128 * itemsize) <= _SMALL_WEIGHT_BYTES

    if small:
        tk, tn = K128, N128
        K_pad, N_pad = K128, N128
    else:
        tk = min(_BIG_TK, K128)
        tn = min(_BIG_TN, N128)
        K_pad, N_pad = _round_up(K, tk), _round_up(N, tn)

    w_p = w_t
    if (K_pad, N_pad) != (K, N):
        w_p = jnp.pad(w_t, ((0, K_pad - K), (0, N_pad - N)))
    w_p = w_p.astype(compute_dtype)

    b_p = jnp.asarray(b).reshape(1, -1)
    if N_pad != N:
        b_p = jnp.pad(b_p, ((0, 0), (0, N_pad - N)))
    b_p = b_p.astype(jnp.float32)

    meta = dict(n_out=N, tk=tk, tn=tn, small=small)
    return w_p, b_p, meta


# ----------------------------------------------------------------------------
# Forward
# ----------------------------------------------------------------------------
@functools.partial(
    jax.jit, static_argnames=("n_out", "tk", "tn", "small", "compute_dtype")
)
def fclayer_forward(x, w_p, b_p, *, n_out, tk, tn, small,
                    compute_dtype=jnp.bfloat16):
    """y = LeakyReLU(x @ W + b, 0.2) with pre-padded/cast W (w_p) and bias (b_p)."""
    B, K = x.shape
    K_pad, N_pad = w_p.shape
    out_dtype = x.dtype

    # bf16 packs 16 sublanes per vreg -> round tm to 16.
    tm = min(_BIG_TM, _round_up(max(B, 1), 16))
    B_pad = _round_up(B, tm)

    x_p = x
    if (B_pad != B) or (K_pad != K):           # skip pad when already aligned
        x_p = jnp.pad(x, ((0, B_pad - B), (0, K_pad - K)))
    x_p = x_p.astype(compute_dtype)

    flops = 2 * B_pad * K_pad * N_pad
    bytes_accessed = (
        B_pad * K_pad * jnp.dtype(compute_dtype).itemsize
        + K_pad * N_pad * jnp.dtype(compute_dtype).itemsize
        + N_pad * 4
        + B_pad * N_pad * jnp.dtype(out_dtype).itemsize
    )
    cost = pl.CostEstimate(
        flops=flops, transcendentals=0, bytes_accessed=bytes_accessed
    )

    if small:
        # Weight + bias fully resident; grid over M only.
        out = pl.pallas_call(
            _fclayer_small_kernel,
            out_shape=jax.ShapeDtypeStruct((B_pad, N_pad), out_dtype),
            grid_spec=pltpu.PrefetchScalarGridSpec(
                num_scalar_prefetch=0,
                grid=(B_pad // tm,),
                in_specs=[
                    pl.BlockSpec((tm, K_pad), lambda i: (i, 0)),      # x tile
                    pl.BlockSpec((K_pad, N_pad), lambda i: (0, 0)),   # whole W
                    pl.BlockSpec((1, N_pad), lambda i: (0, 0)),       # whole bias
                ],
                out_specs=pl.BlockSpec((tm, N_pad), lambda i: (i, 0)),
            ),
            compiler_params=pltpu.CompilerParams(
                dimension_semantics=("parallel",),
                vmem_limit_bytes=_VMEM_LIMIT,
            ),
            cost_estimate=cost,
        )(x_p, w_p, b_p)
    else:
        grid = (B_pad // tm, N_pad // tn, K_pad // tk)
        out = pl.pallas_call(
            _fclayer_gemm_kernel,
            out_shape=jax.ShapeDtypeStruct((B_pad, N_pad), out_dtype),
            grid_spec=pltpu.PrefetchScalarGridSpec(
                num_scalar_prefetch=0,
                grid=grid,
                in_specs=[
                    pl.BlockSpec((tm, tk), lambda i, j, k: (i, k)),   # x tile
                    pl.BlockSpec((tk, tn), lambda i, j, k: (k, j)),   # W tile
                    pl.BlockSpec((1, tn), lambda i, j, k: (0, j)),    # bias tile
                ],
                out_specs=pl.BlockSpec((tm, tn), lambda i, j, k: (i, j)),
                scratch_shapes=[pltpu.VMEM((tm, tn), jnp.float32)],
            ),
            compiler_params=pltpu.CompilerParams(
                dimension_semantics=("parallel", "parallel", "arbitrary"),
                vmem_limit_bytes=_VMEM_LIMIT,
            ),
            cost_estimate=cost,
        )(x_p, w_p, b_p)

    if (B_pad != B) or (N_pad != n_out):
        out = out[:B, :n_out]
    return out


# ----------------------------------------------------------------------------
# Init / reference
# ----------------------------------------------------------------------------
def init_fclayer_params(key, innodes, nodes, dtype=jnp.float32):
    # Mimics nn.Linear default init: U(-1/sqrt(innodes), 1/sqrt(innodes)).
    kw, kb = jax.random.split(key)
    bound = float(1.0 / (innodes ** 0.5))
    # PyTorch weight is (nodes, innodes); store transposed (innodes, nodes).
    w_t = jax.random.uniform(kw, (innodes, nodes), dtype, -bound, bound)
    b = jax.random.uniform(kb, (1, nodes), dtype, -bound, bound)
    return w_t, b


def fclayer_reference(x, w_t, b):
    y = jnp.dot(x, w_t, precision=jax.lax.Precision.HIGHEST) + b
    return jnp.maximum(y, 0.2 * y)


if __name__ == "__main__":
    key = jax.random.PRNGKey(0)
    k_x, k_p, k_x2, k_p2 = jax.random.split(key, 4)

    # --- Small path: the real FClayer shapes (weight fully VMEM-resident). ---
    batch, innodes, nodes = 8, 32, 64
    x = jax.random.normal(k_x, (batch, innodes), jnp.float32)
    w_t, b = init_fclayer_params(k_p, innodes, nodes)

    w_p, b_p, meta = prepare_fclayer_params(w_t, b)   # one-time pad + bf16 cast
    out = jax.block_until_ready(fclayer_forward(x, w_p, b_p, **meta))
    assert out.shape == (batch, nodes)
    assert meta["small"]

    # Tight check vs. a reference using the same bf16 input rounding.
    x_r = x.astype(jnp.bfloat16).astype(jnp.float32)
    w_r = w_t.astype(jnp.bfloat16).astype(jnp.float32)
    ref_bf16 = fclayer_reference(x_r, w_r, b)
    assert jnp.allclose(out, ref_bf16, atol=1e-4, rtol=1e-4)

    # Loose check vs. pure-f32 PyTorch semantics.
    ref_f32 = fclayer_reference(x, w_t, b)
    assert jnp.allclose(out, ref_f32, atol=3e-2, rtol=3e-2)

    # --- Big path: generic tiled GEMM (large tiles, resident f32 accumulator). ---
    B2, K2, N2 = 40, 1024, 1536
    x2 = jax.random.normal(k_x2, (B2, K2), jnp.float32)
    w2, b2 = init_fclayer_params(k_p2, K2, N2)
    w2_p, b2_p, meta2 = prepare_fclayer_params(w2, b2)
    assert not meta2["small"]
    out2 = jax.block_until_ready(fclayer_forward(x2, w2_p, b2_p, **meta2))
    assert out2.shape == (B2, N2)

    x2_r = x2.astype(jnp.bfloat16).astype(jnp.float32)
    w2_r = w2.astype(jnp.bfloat16).astype(jnp.float32)
    ref2 = fclayer_reference(x2_r, w2_r, b2)
    assert jnp.allclose(out2, ref2, atol=1e-3, rtol=1e-3)

    print("KERNEL_OK")
</pallas_src>

<mosaic_0001>
module attributes {stable_mosaic.version = 11 : i64} {
  func.func @_fclayer_small_kernel(%arg0: i32, %arg1: memref<16x128xbf16, #tpu.memory_space<vmem>>, %arg2: memref<128x128xbf16, #tpu.memory_space<vmem>>, %arg3: memref<1x128xf32, #tpu.memory_space<vmem>>, %arg4: memref<16x128xf32, #tpu.memory_space<vmem>>) attributes {dimension_semantics = [#tpu.dimension_semantics<parallel>], iteration_bounds = array<i64: 1>, scalar_prefetch = 0 : i64, scratch_operands = 0 : i64, tpu.core_type = #tpu.core_type<tc>, window_params = [{transform_indices = @transform_0, window_bounds = array<i64: 16, 128>}, {pipeline_mode = #tpu.pipeline_mode<synchronous>, transform_indices = @transform_1, window_bounds = array<i64: 128, 128>}, {pipeline_mode = #tpu.pipeline_mode<synchronous>, transform_indices = @transform_2, window_bounds = array<i64: 1, 128>}, {transform_indices = @transform_3, window_bounds = array<i64: 16, 128>}]} {
    %c0 = arith.constant 0 : index
    %c0_0 = arith.constant 0 : index
    %0 = vector.load %arg1[%c0, %c0_0] : memref<16x128xbf16, #tpu.memory_space<vmem>>, vector<16x128xbf16>
    %c0_1 = arith.constant 0 : index
    %c0_2 = arith.constant 0 : index
    %1 = vector.load %arg2[%c0_1, %c0_2] : memref<128x128xbf16, #tpu.memory_space<vmem>>, vector<128x128xbf16>
    %cst = arith.constant dense<0.000000e+00> : vector<16x128xf32>
    %2 = tpu.matmul %0, %1, %cst {dimension_numbers = #tpu.dot_dimension_numbers<[1], [0], [0], [1], [0, 0, 1, 1], [], []>} : vector<16x128xbf16>, vector<128x128xbf16>, vector<16x128xf32> -> vector<16x128xf32>
    %c0_3 = arith.constant 0 : index
    %c0_4 = arith.constant 0 : index
    %3 = vector.load %arg3[%c0_3, %c0_4] : memref<1x128xf32, #tpu.memory_space<vmem>>, vector<1x128xf32>
    %4 = vector.broadcast %3 : vector<1x128xf32> to vector<16x128xf32>
    %5 = arith.addf %2, %4 : vector<16x128xf32>
    %cst_5 = arith.constant 2.000000e-01 : f32
    %6 = vector.broadcast %cst_5 : f32 to vector<16x128xf32>
    %7 = arith.mulf %6, %5 : vector<16x128xf32>
    %8 = arith.maximumf %5, %7 : vector<16x128xf32>
    %c0_6 = arith.constant 0 : index
    %c0_7 = arith.constant 0 : index
    %9 = vector.load %arg4[%c0_6, %c0_7] : memref<16x128xf32, #tpu.memory_space<vmem>>, vector<16x128xf32>
    tpu.vector_store %arg4[%c0_6, %c0_7], %8 {strides = array<i32>} : memref<16x128xf32, #tpu.memory_space<vmem>>, vector<16x128xf32>,
    return
  }
  func.func @transform_0(%arg0: i32) -> (i32, i32) {
    %c0_i32 = arith.constant 0 : i32
    %c0_i32_0 = arith.constant 0 : i32
    return %arg0, %c0_i32 : i32, i32
  }
  func.func @transform_1(%arg0: i32) -> (i32, i32) {
    %c0_i32 = arith.constant 0 : i32
    %c0_i32_0 = arith.constant 0 : i32
    %c0_i32_1 = arith.constant 0 : i32
    return %c0_i32, %c0_i32_0 : i32, i32
  }
  func.func @transform_2(%arg0: i32) -> (i32, i32) {
    %c0_i32 = arith.constant 0 : i32
    %c0_i32_0 = arith.constant 0 : i32
    %c0_i32_1 = arith.constant 0 : i32
    return %c0_i32, %c0_i32_0 : i32, i32
  }
  func.func @transform_3(%arg0: i32) -> (i32, i32) {
    %c0_i32 = arith.constant 0 : i32
    %c0_i32_0 = arith.constant 0 : i32
    return %arg0, %c0_i32 : i32, i32
  }
}

</mosaic_0001>

<bundles_post_ra>
// kernel: fclayer_forward.1
= control target key start
LH: loop header
LB: loop body
LE: loop exit
PB: predicated region body
PF: predicated region fallthrough
CT: control target
= control target key end

     0   :  { %8 = vsyncpa [#allocation3], 0  ;;  %s237_s12 = smov [#allocation2]   ;;  %s286_s0 = inlined_call_operand.vmem [shape: bf16[16,128], index: 0, kind: input, shape index: {}]   ;;  %s287_s1 = inlined_call_operand.hbm [shape: bf16[128,128], index: 1, kind: input, shape index: {}]   ;;  %s288_s2 = inlined_call_operand.vmem [shape: f32[1,128], index: 2, kind: input, shape index: {}]   ;;  %s289_s3 = inlined_call_operand.vmem [shape: f32[16,128], index: 3, kind: output, shape index: {}]  }
   0x1   :  { %s16_s13 = sshll.u32 %s237_s12, 4  ;;  %s213_s16 = scalar_lea.hbm %s287_s1, 1024  ;;  %s17_s13 = int_to_ptr.vmem [resolvable:$true] %s16_s13 }
   0x2   :  { %p214_p0 = scmp.ne.s32.totalorder %s287_s1, %s213_s16  ;;  %p217_p1 = scmp.lt.u32.totalorder %s213_s16, %s287_s1 }
   0x4   :  { %p219_p2 = pnand %p217_p1, %p214_p0 }
   0x6   :  { %222 = shalt.err (!%p219_p2)
}
   0x7   :  { %s223_s21 = scalar_lea.vmem %s17_s13, 1024  ;;  %p228_p4 = scmp.lt.s32.totalorder %s17_s13, %s17_s13 }
   0x8   :  { %p224_p3 = scmp.ne.s32.totalorder %s17_s13, %s223_s21  ;;  %p229_p5 = scmp.lt.s32.totalorder %s223_s21, %s223_s21 }
   0xa   :  { %p230_p6 = por %p229_p5, %p228_p4 }
   0xc   :  { %p231_p7 = pnand %p230_p6, %p224_p3 }
   0xe   :  { %234 = shalt.err (!%p231_p7)
}
   0xf   :  { %s238_s22 = smov 64   ;;  %s239_s23 = smov 4  }
  0x10   :  { %22 = dma.hbm_to_vmem [thread:$0]  %s287_s1, 1024, %s17_s13, [#allocation3], %s238_s22, %s238_s22, %s239_s23  }
  0x11   :  { %235 = dma.done.wait [#allocation3], 1024  }
  0x12   :  { %236 = vsyncadd [#allocation3], 4294966272  ;;  %v240_v0 = vmov 0.0   ;;  %vm241_vm0 = vmmov 0   ;;  %v204_v1 = vld [vmem:[#allocation2] sm:$0xff]   ;;  %v205_v2 = vld [vmem:[#allocation2 + $0x8] sm:$0xff]  }
  0x13   :  { %179 = vmatprep.subr.bf16.mxu0 %v240_v0  ;;  %195 = vmatprep.mubr.msk.bf16.mxu0 %vm241_vm0, %v240_v0  ;;  %v206_v3 = vld [vmem:[#allocation2 + $0x10] sm:$0xff]   ;;  %v207_v4 = vld [vmem:[#allocation2 + $0x18] sm:$0xff]   ;;  %v208_v5 = vld [vmem:[#allocation2 + $0x20] sm:$0xff]  }
  0x14   :  { %180 = vmatpush3.bf16.msra.mxu0 %v204_v1  ;;  %v209_v6 = vld [vmem:[#allocation2 + $0x28] sm:$0xff]   ;;  %v210_v7 = vld [vmem:[#allocation2 + $0x30] sm:$0xff]   ;;  %v211_v8 = vld [vmem:[#allocation2 + $0x38] sm:$0xff]  }
  0x15   :  { %181 = vmatprep.subr.bf16.mxu0 %v240_v0  ;;  %v212_v9 = vld [vmem:[%s286_s0] sm:$0xff]  }
  0x16   :  { %v160_v10 = vld [vmem:[%s288_s2] ss:$0 sm:$0xff] }
  0x18   :  { %182 = vmatpush3.bf16.msra.mxu0 %v205_v2 }
  0x19   :  { %183 = vmatprep.subr.bf16.mxu0 %v240_v0 }
  0x1c   :  { %184 = vmatpush3.bf16.msra.mxu0 %v206_v3 }
  0x1d   :  { %185 = vmatprep.subr.bf16.mxu0 %v240_v0 }
  0x20   :  { %186 = vmatpush3.bf16.msra.mxu0 %v207_v4 }
  0x21   :  { %187 = vmatprep.subr.bf16.mxu0 %v240_v0 }
  0x24   :  { %188 = vmatpush3.bf16.msra.mxu0 %v208_v5 }
  0x25   :  { %189 = vmatprep.subr.bf16.mxu0 %v240_v0 }
  0x28   :  { %190 = vmatpush3.bf16.msra.mxu0 %v209_v6 }
  0x29   :  { %191 = vmatprep.subr.bf16.mxu0 %v240_v0 }
  0x2c   :  { %192 = vmatpush3.bf16.msra.mxu0 %v210_v7 }
  0x2d   :  { %193 = vmatprep.subr.bf16.mxu0 %v240_v0 }
  0x30   :  { %194 = vmatpush3.bf16.msra.mxu0 %v211_v8 }
  0x33   :  { %196 = vmatmul.mubr.bf16.vlgmr.msra.gmra.mrb[0].mxu0 %v212_v9 }
 0x106   :  { %v142_v11 = vpop.f32.mrb[0].mxu0 }
 0x107   :  { %v143_v12 = vadd.f32 %v160_v10, %v142_v11  ;;  %v197_v13 = vpop.f32.mrb[1].mxu0 }
 0x108   :  { %v145_v14 = vpop.f32.mrb[2].mxu0 }
 0x109   :  { %v149_v15 = vmul.f32 0.2, %v143_v12  ;;  %v146_v16 = vadd.f32 %v160_v10, %v145_v14  ;;  %v198_v17 = vpop.f32.mrb[3].mxu0 }
 0x10b   :  { %v151_v18 = vmax.f32 %v143_v12, %v149_v15  ;;  %v150_v19 = vmul.f32 0.2, %v146_v16 }
 0x10d   :  { %153 = vst [vmem:[%s289_s3] sm:$0xff] %v151_v18  ;;  %v152_v20 = vmax.f32 %v146_v16, %v150_v19 }
 0x10f   :  { %154 = vst [vmem:[%s289_s3 + $0x8] sm:$0xff] %v152_v20 }
 0x110   :  { %159 = vsyncpa [#allocation3], 1 }

</bundles_post_ra>
